<compile_context>
chip_gen: v6e
topology: v6e:2x2x1
jax: 0.10.0
libtpu: 0.0.40
codegen_flags: <defaults>
</compile_context>

<pallas_src>
import functools

import numpy as np
import jax
import jax.numpy as jnp
from jax import lax
from jax.experimental import pallas as pl
from jax.experimental.pallas import tpu as pltpu


def _round_up(x, m):
    return ((x + m - 1) // m) * m


# ---------------------------------------------------------------------------
# Fused MLP kernel.
#   kernel(x, w0, b0, ..., wH, bH, embed_slab, out)
#     z_i      = h_i @ w_i + b_i        (pre-ReLU embed, written to the slab)
#     h_{i+1}  = relu(z_i)
#     out      = h_H @ w_H + b_H        (final layer, no activation)
# Weights arrive pre-transposed (in, out) and already in `compute_dtype`;
# biases arrive f32; accumulation is f32 on the MXU.
# ---------------------------------------------------------------------------
def _make_mlp_kernel(num_hidden, embed_offsets, compute_dtype):
    def kernel(x_ref, *refs):
        n_param = 2 * (num_hidden + 1)
        p_refs = refs[:n_param]
        o_refs = refs[n_param:]
        out_ref = o_refs[-1]

        h = x_ref[...].astype(compute_dtype)
        for i in range(num_hidden):
            w = p_refs[2 * i][...]
            b = p_refs[2 * i + 1][...]
            z = jnp.dot(h, w, preferred_element_type=jnp.float32) + b
            lo, hi = embed_offsets[i], embed_offsets[i + 1]
            # Static, 128-aligned lane slice of the wide embed slab.
            o_refs[0][:, lo:hi] = z.astype(o_refs[0].dtype)
            h = jnp.maximum(z, 0.0).astype(compute_dtype)

        w = p_refs[2 * num_hidden][...]
        b = p_refs[2 * num_hidden + 1][...]
        y = jnp.dot(h, w, preferred_element_type=jnp.float32) + b
        out_ref[...] = y.astype(out_ref.dtype)

    return kernel


# ---------------------------------------------------------------------------
# Wrapper: pads everything to lane-dense shapes, runs one fused pallas_call,
# slices the padding back off.  `layers` is a tuple of (w, b) with
# w: (d_in, d_out) (pre-transposed) and b: (1, d_out) or (d_out,), all f32.
# Returns (embeds_list, final_out) exactly like nnetFeedforward.forward.
# ---------------------------------------------------------------------------
def mlp_forward(x, layers, *, compute_dtype=jnp.float32, row_tile=1024):
    B, d_in = x.shape
    num_hidden = len(layers) - 1
    out_dtype = x.dtype

    # ---- parameter prep: zero-pad every feature dim to a multiple of 128 ----
    d_in_pad = _round_up(d_in, 128)
    padded_params = []
    out_dims, out_dims_pad = [], []
    prev, prev_pad = d_in, d_in_pad
    for (w, b) in layers:
        di, do = w.shape
        assert di == prev, "layer chaining mismatch"
        do_pad = _round_up(do, 128)
        b2 = jnp.reshape(b, (1, -1)).astype(jnp.float32)
        wp = (jnp.zeros((prev_pad, do_pad), compute_dtype)
              .at[:di, :do].set(w.astype(compute_dtype)))
        bp = jnp.zeros((1, do_pad), jnp.float32).at[:, :do].set(b2)
        padded_params += [wp, bp]
        out_dims.append(do)
        out_dims_pad.append(do_pad)
        prev, prev_pad = do, do_pad

    # ---- row tile: large (amortize per-step overhead) but >= 2 grid steps ----
    tm = max(8, min(row_tile, _round_up(pl.cdiv(B, 2), 8)))
    padded_b = _round_up(B, tm)
    x_p = jnp.zeros((padded_b, d_in_pad), x.dtype).at[:B, :d_in].set(x)

    # ---- specs ----
    in_specs = [pl.BlockSpec((tm, d_in_pad), lambda i: (i, 0))]
    for p in padded_params:
        # Full-array, constant-index blocks: weights/biases stay resident.
        in_specs.append(pl.BlockSpec(p.shape, lambda i: (0, 0)))

    embed_offsets = [0]
    for d in out_dims_pad[:num_hidden]:
        embed_offsets.append(embed_offsets[-1] + d)
    embed_width = embed_offsets[-1]

    out_shapes, out_specs = [], []
    if num_hidden > 0:
        out_shapes.append(jax.ShapeDtypeStruct((padded_b, embed_width), out_dtype))
        out_specs.append(pl.BlockSpec((tm, embed_width), lambda i: (i, 0)))
    out_shapes.append(jax.ShapeDtypeStruct((padded_b, out_dims_pad[-1]), out_dtype))
    out_specs.append(pl.BlockSpec((tm, out_dims_pad[-1]), lambda i: (i, 0)))

    outs = pl.pallas_call(
        _make_mlp_kernel(num_hidden, tuple(embed_offsets), compute_dtype),
        out_shape=tuple(out_shapes),
        grid_spec=pltpu.PrefetchScalarGridSpec(
            num_scalar_prefetch=0,
            grid=(padded_b // tm,),
            in_specs=in_specs,
            out_specs=tuple(out_specs),
        ),
        compiler_params=pltpu.CompilerParams(
            dimension_semantics=("parallel",),
            vmem_limit_bytes=32 * 1024 * 1024,
        ),
    )(x_p, *padded_params)

    final = outs[-1][:B, :out_dims[-1]]
    embeds = []
    if num_hidden > 0:
        slab = outs[0]
        embeds = [slab[:B, embed_offsets[i]: embed_offsets[i] + out_dims[i]]
                  for i in range(num_hidden)]
    return embeds, final


# ---------------------------------------------------------------------------
# Pure-JAX references (for validation).
# ---------------------------------------------------------------------------
def reference_forward_f32(x, layers):
    embeds = []
    h = x
    for (w, b) in layers[:-1]:
        z = jnp.dot(h, w, precision=lax.Precision.HIGHEST) + jnp.reshape(b, (1, -1))
        embeds.append(z)
        h = jnp.maximum(z, 0.0)
    w, b = layers[-1]
    return embeds, jnp.dot(h, w, precision=lax.Precision.HIGHEST) + jnp.reshape(b, (1, -1))


def reference_forward_cast(x, layers, compute_dtype):
    # Same math as the kernel's low-precision path: cast operands, f32 accum.
    embeds = []
    h = x.astype(compute_dtype)
    for (w, b) in layers[:-1]:
        z = jnp.dot(h, w.astype(compute_dtype),
                    preferred_element_type=jnp.float32) + jnp.reshape(b, (1, -1))
        embeds.append(z.astype(x.dtype))
        h = jnp.maximum(z, 0.0).astype(compute_dtype)
    w, b = layers[-1]
    y = jnp.dot(h, w.astype(compute_dtype),
                preferred_element_type=jnp.float32) + jnp.reshape(b, (1, -1))
    return embeds, y.astype(x.dtype)


# ---------------------------------------------------------------------------
# Deterministic parameter init (shapes per nnetFeedforward.__init__; weights
# stored pre-transposed to (in, out), bias as (1, out)).
# ---------------------------------------------------------------------------
def init_layers(key, input_size, num_layers, hidden_size, out_size):
    in_sizes = [input_size] + [hidden_size] * num_layers
    out_sizes = [hidden_size] * num_layers + [out_size]
    keys = jax.random.split(key, 2 * len(in_sizes))
    layers = []
    for idx, (di, do) in enumerate(zip(in_sizes, out_sizes)):
        bound = 1.0 / float(np.sqrt(di))  # torch.nn.Linear default range
        w = jax.random.uniform(keys[2 * idx], (di, do), jnp.float32, -bound, bound)
        b = jax.random.uniform(keys[2 * idx + 1], (1, do), jnp.float32, -bound, bound)
        layers.append((w, b))
    return tuple(layers)


if __name__ == "__main__":
    # Small config consistent with the module's forward.
    input_size, num_layers, hidden_size, out_size = 64, 3, 128, 32
    batch = 256

    key = jax.random.PRNGKey(0)
    pkey, xkey = jax.random.split(key)
    layers = init_layers(pkey, input_size, num_layers, hidden_size, out_size)
    x = jax.random.normal(xkey, (batch, input_size), jnp.float32)

    # ---- f32 path (exact PyTorch-module semantics) ----
    fwd_f32 = jax.jit(functools.partial(mlp_forward, layers=layers,
                                        compute_dtype=jnp.float32))
    embeds, out = fwd_f32(x)
    jax.block_until_ready((embeds, out))

    embeds_ref, out_ref = reference_forward_f32(x, layers)
    assert out.shape == (batch, out_size), out.shape
    assert len(embeds) == num_layers
    assert np.all(np.isfinite(np.asarray(out)))
    for e, er in zip(embeds, embeds_ref):
        assert e.shape == (batch, hidden_size), e.shape
        np.testing.assert_allclose(np.asarray(e), np.asarray(er), atol=2e-3, rtol=1e-2)
    np.testing.assert_allclose(np.asarray(out), np.asarray(out_ref), atol=2e-3, rtol=1e-2)

    # ---- bf16 path (v6e/v7x MXU-rate path), validated against matching math ----
    fwd_bf16 = jax.jit(functools.partial(mlp_forward, layers=layers,
                                         compute_dtype=jnp.bfloat16))
    embeds_bf, out_bf = fwd_bf16(x)
    jax.block_until_ready((embeds_bf, out_bf))

    embeds_ref_bf, out_ref_bf = reference_forward_cast(x, layers, jnp.bfloat16)
    assert out_bf.shape == (batch, out_size)
    for e, er in zip(embeds_bf, embeds_ref_bf):
        np.testing.assert_allclose(np.asarray(e), np.asarray(er), atol=2e-3, rtol=1e-2)
    np.testing.assert_allclose(np.asarray(out_bf), np.asarray(out_ref_bf),
                               atol=2e-3, rtol=1e-2)

    print("KERNEL_OK")
</pallas_src>

<mosaic_0001>
module attributes {stable_mosaic.version = 11 : i64} {
  func.func @kernel(%arg0: i32, %arg1: memref<128x128xf32, #tpu.memory_space<vmem>>, %arg2: memref<128x128xf32, #tpu.memory_space<vmem>>, %arg3: memref<1x128xf32, #tpu.memory_space<vmem>>, %arg4: memref<128x128xf32, #tpu.memory_space<vmem>>, %arg5: memref<1x128xf32, #tpu.memory_space<vmem>>, %arg6: memref<128x128xf32, #tpu.memory_space<vmem>>, %arg7: memref<1x128xf32, #tpu.memory_space<vmem>>, %arg8: memref<128x128xf32, #tpu.memory_space<vmem>>, %arg9: memref<1x128xf32, #tpu.memory_space<vmem>>, %arg10: memref<128x384xf32, #tpu.memory_space<vmem>>, %arg11: memref<128x128xf32, #tpu.memory_space<vmem>>) attributes {dimension_semantics = [#tpu.dimension_semantics<parallel>], iteration_bounds = array<i64: 2>, scalar_prefetch = 0 : i64, scratch_operands = 0 : i64, tpu.core_type = #tpu.core_type<tc>, window_params = [{transform_indices = @transform_0, window_bounds = array<i64: 128, 128>}, {pipeline_mode = #tpu.pipeline_mode<synchronous>, transform_indices = @transform_1, window_bounds = array<i64: 128, 128>}, {pipeline_mode = #tpu.pipeline_mode<synchronous>, transform_indices = @transform_2, window_bounds = array<i64: 1, 128>}, {pipeline_mode = #tpu.pipeline_mode<synchronous>, transform_indices = @transform_3, window_bounds = array<i64: 128, 128>}, {pipeline_mode = #tpu.pipeline_mode<synchronous>, transform_indices = @transform_4, window_bounds = array<i64: 1, 128>}, {pipeline_mode = #tpu.pipeline_mode<synchronous>, transform_indices = @transform_5, window_bounds = array<i64: 128, 128>}, {pipeline_mode = #tpu.pipeline_mode<synchronous>, transform_indices = @transform_6, window_bounds = array<i64: 1, 128>}, {pipeline_mode = #tpu.pipeline_mode<synchronous>, transform_indices = @transform_7, window_bounds = array<i64: 128, 128>}, {pipeline_mode = #tpu.pipeline_mode<synchronous>, transform_indices = @transform_8, window_bounds = array<i64: 1, 128>}, {transform_indices = @transform_9, window_bounds = array<i64: 128, 384>}, {transform_indices = @transform_10, window_bounds = array<i64: 128, 128>}]} {
    %c0 = arith.constant 0 : index
    %c0_0 = arith.constant 0 : index
    %0 = vector.load %arg1[%c0, %c0_0] : memref<128x128xf32, #tpu.memory_space<vmem>>, vector<128x128xf32>
    %c0_1 = arith.constant 0 : index
    %c0_2 = arith.constant 0 : index
    %1 = vector.load %arg2[%c0_1, %c0_2] : memref<128x128xf32, #tpu.memory_space<vmem>>, vector<128x128xf32>
    %c0_3 = arith.constant 0 : index
    %c0_4 = arith.constant 0 : index
    %2 = vector.load %arg3[%c0_3, %c0_4] : memref<1x128xf32, #tpu.memory_space<vmem>>, vector<1x128xf32>
    %cst = arith.constant dense<0.000000e+00> : vector<128x128xf32>
    %3 = tpu.matmul %0, %1, %cst {dimension_numbers = #tpu.dot_dimension_numbers<[1], [0], [0], [1], [0, 0, 1, 1], [], []>} : vector<128x128xf32>, vector<128x128xf32>, vector<128x128xf32> -> vector<128x128xf32>
    %4 = vector.broadcast %2 : vector<1x128xf32> to vector<128x128xf32>
    %5 = arith.addf %3, %4 : vector<128x128xf32>
    %c0_5 = arith.constant 0 : index
    %c0_6 = arith.constant 0 : index
    %6 = vector.load %arg10[%c0_5, %c0_6] : memref<128x384xf32, #tpu.memory_space<vmem>>, vector<128x128xf32>
    tpu.vector_store %arg10[%c0_5, %c0_6], %5 {strides = array<i32>} : memref<128x384xf32, #tpu.memory_space<vmem>>, vector<128x128xf32>,
    %cst_7 = arith.constant 0.000000e+00 : f32
    %7 = vector.broadcast %cst_7 : f32 to vector<128x128xf32>
    %8 = arith.maximumf %5, %7 : vector<128x128xf32>
    %c0_8 = arith.constant 0 : index
    %c0_9 = arith.constant 0 : index
    %9 = vector.load %arg4[%c0_8, %c0_9] : memref<128x128xf32, #tpu.memory_space<vmem>>, vector<128x128xf32>
    %c0_10 = arith.constant 0 : index
    %c0_11 = arith.constant 0 : index
    %10 = vector.load %arg5[%c0_10, %c0_11] : memref<1x128xf32, #tpu.memory_space<vmem>>, vector<1x128xf32>
    %cst_12 = arith.constant dense<0.000000e+00> : vector<128x128xf32>
    %11 = tpu.matmul %8, %9, %cst_12 {dimension_numbers = #tpu.dot_dimension_numbers<[1], [0], [0], [1], [0, 0, 1, 1], [], []>} : vector<128x128xf32>, vector<128x128xf32>, vector<128x128xf32> -> vector<128x128xf32>
    %12 = vector.broadcast %10 : vector<1x128xf32> to vector<128x128xf32>
    %13 = arith.addf %11, %12 : vector<128x128xf32>
    %c0_13 = arith.constant 0 : index
    %c128 = arith.constant 128 : index
    %14 = vector.load %arg10[%c0_13, %c128] : memref<128x384xf32, #tpu.memory_space<vmem>>, vector<128x128xf32>
    tpu.vector_store %arg10[%c0_13, %c128], %13 {strides = array<i32>} : memref<128x384xf32, #tpu.memory_space<vmem>>, vector<128x128xf32>,
    %cst_14 = arith.constant 0.000000e+00 : f32
    %15 = vector.broadcast %cst_14 : f32 to vector<128x128xf32>
    %16 = arith.maximumf %13, %15 : vector<128x128xf32>
    %c0_15 = arith.constant 0 : index
    %c0_16 = arith.constant 0 : index
    %17 = vector.load %arg6[%c0_15, %c0_16] : memref<128x128xf32, #tpu.memory_space<vmem>>, vector<128x128xf32>
    %c0_17 = arith.constant 0 : index
    %c0_18 = arith.constant 0 : index
    %18 = vector.load %arg7[%c0_17, %c0_18] : memref<1x128xf32, #tpu.memory_space<vmem>>, vector<1x128xf32>
    %cst_19 = arith.constant dense<0.000000e+00> : vector<128x128xf32>
    %19 = tpu.matmul %16, %17, %cst_19 {dimension_numbers = #tpu.dot_dimension_numbers<[1], [0], [0], [1], [0, 0, 1, 1], [], []>} : vector<128x128xf32>, vector<128x128xf32>, vector<128x128xf32> -> vector<128x128xf32>
    %20 = vector.broadcast %18 : vector<1x128xf32> to vector<128x128xf32>
    %21 = arith.addf %19, %20 : vector<128x128xf32>
    %c0_20 = arith.constant 0 : index
    %c256 = arith.constant 256 : index
    %22 = vector.load %arg10[%c0_20, %c256] : memref<128x384xf32, #tpu.memory_space<vmem>>, vector<128x128xf32>
    tpu.vector_store %arg10[%c0_20, %c256], %21 {strides = array<i32>} : memref<128x384xf32, #tpu.memory_space<vmem>>, vector<128x128xf32>,
    %cst_21 = arith.constant 0.000000e+00 : f32
    %23 = vector.broadcast %cst_21 : f32 to vector<128x128xf32>
    %24 = arith.maximumf %21, %23 : vector<128x128xf32>
    %c0_22 = arith.constant 0 : index
    %c0_23 = arith.constant 0 : index
    %25 = vector.load %arg8[%c0_22, %c0_23] : memref<128x128xf32, #tpu.memory_space<vmem>>, vector<128x128xf32>
    %c0_24 = arith.constant 0 : index
    %c0_25 = arith.constant 0 : index
    %26 = vector.load %arg9[%c0_24, %c0_25] : memref<1x128xf32, #tpu.memory_space<vmem>>, vector<1x128xf32>
    %cst_26 = arith.constant dense<0.000000e+00> : vector<128x128xf32>
    %27 = tpu.matmul %24, %25, %cst_26 {dimension_numbers = #tpu.dot_dimension_numbers<[1], [0], [0], [1], [0, 0, 1, 1], [], []>} : vector<128x128xf32>, vector<128x128xf32>, vector<128x128xf32> -> vector<128x128xf32>
    %28 = vector.broadcast %26 : vector<1x128xf32> to vector<128x128xf32>
    %29 = arith.addf %27, %28 : vector<128x128xf32>
    %c0_27 = arith.constant 0 : index
    %c0_28 = arith.constant 0 : index
    %30 = vector.load %arg11[%c0_27, %c0_28] : memref<128x128xf32, #tpu.memory_space<vmem>>, vector<128x128xf32>
    tpu.vector_store %arg11[%c0_27, %c0_28], %29 {strides = array<i32>} : memref<128x128xf32, #tpu.memory_space<vmem>>, vector<128x128xf32>,
    return
  }
  func.func @transform_0(%arg0: i32) -> (i32, i32) {
    %c0_i32 = arith.constant 0 : i32
    %c0_i32_0 = arith.constant 0 : i32
    return %arg0, %c0_i32 : i32, i32
  }
  func.func @transform_1(%arg0: i32) -> (i32, i32) {
    %c0_i32 = arith.constant 0 : i32
    %c0_i32_0 = arith.constant 0 : i32
    %c0_i32_1 = arith.constant 0 : i32
    return %c0_i32, %c0_i32_0 : i32, i32
  }
  func.func @transform_2(%arg0: i32) -> (i32, i32) {
    %c0_i32 = arith.constant 0 : i32
    %c0_i32_0 = arith.constant 0 : i32
    %c0_i32_1 = arith.constant 0 : i32
    return %c0_i32, %c0_i32_0 : i32, i32
  }
  func.func @transform_3(%arg0: i32) -> (i32, i32) {
    %c0_i32 = arith.constant 0 : i32
    %c0_i32_0 = arith.constant 0 : i32
    %c0_i32_1 = arith.constant 0 : i32
    return %c0_i32, %c0_i32_0 : i32, i32
  }
  func.func @transform_4(%arg0: i32) -> (i32, i32) {
    %c0_i32 = arith.constant 0 : i32
    %c0_i32_0 = arith.constant 0 : i32
    %c0_i32_1 = arith.constant 0 : i32
    return %c0_i32, %c0_i32_0 : i32, i32
  }
  func.func @transform_5(%arg0: i32) -> (i32, i32) {
    %c0_i32 = arith.constant 0 : i32
    %c0_i32_0 = arith.constant 0 : i32
    %c0_i32_1 = arith.constant 0 : i32
    return %c0_i32, %c0_i32_0 : i32, i32
  }
  func.func @transform_6(%arg0: i32) -> (i32, i32) {
    %c0_i32 = arith.constant 0 : i32
    %c0_i32_0 = arith.constant 0 : i32
    %c0_i32_1 = arith.constant 0 : i32
    return %c0_i32, %c0_i32_0 : i32, i32
  }
  func.func @transform_7(%arg0: i32) -> (i32, i32) {
    %c0_i32 = arith.constant 0 : i32
    %c0_i32_0 = arith.constant 0 : i32
    %c0_i32_1 = arith.constant 0 : i32
    return %c0_i32, %c0_i32_0 : i32, i32
  }
  func.func @transform_8(%arg0: i32) -> (i32, i32) {
    %c0_i32 = arith.constant 0 : i32
    %c0_i32_0 = arith.constant 0 : i32
    %c0_i32_1 = arith.constant 0 : i32
    return %c0_i32, %c0_i32_0 : i32, i32
  }
  func.func @transform_9(%arg0: i32) -> (i32, i32) {
    %c0_i32 = arith.constant 0 : i32
    %c0_i32_0 = arith.constant 0 : i32
    return %arg0, %c0_i32 : i32, i32
  }
  func.func @transform_10(%arg0: i32) -> (i32, i32) {
    %c0_i32 = arith.constant 0 : i32
    %c0_i32_0 = arith.constant 0 : i32
    return %arg0, %c0_i32 : i32, i32
  }
}

</mosaic_0001>

<bundles_post_ra>
// kernel: mlp_forward.1
= control target key start
LH: loop header
LB: loop body
LE: loop exit
PB: predicated region body
PF: predicated region fallthrough
CT: control target
= control target key end

     0   :  { %s1712_s13 = smov 0   ;;  %s2084_s0 = inlined_call_operand.vmem [shape: f32[256,128], index: 0, kind: input, shape index: {}]   ;;  %s2085_s1 = inlined_call_operand.vmem [shape: f32[128,128], index: 1, kind: input, shape index: {}]   ;;  %s2086_s2 = inlined_call_operand.vmem [shape: f32[1,128], index: 2, kind: input, shape index: {}]   ;;  %s2087_s3 = inlined_call_operand.vmem [shape: f32[128,128], index: 3, kind: input, shape index: {}]   ;;  %s2088_s4 = inlined_call_operand.vmem [shape: f32[1,128], index: 4, kind: input, shape index: {}]   ;;  %s2089_s5 = inlined_call_operand.vmem [shape: f32[128,128], index: 5, kind: input, shape index: {}]   ;;  %s2090_s6 = inlined_call_operand.vmem [shape: f32[1,128], index: 6, kind: input, shape index: {}]   ;;  %s2091_s7 = inlined_call_operand.vmem [shape: f32[128,128], index: 7, kind: input, shape index: {}]   ;;  %s2092_s8 = inlined_call_operand.vmem [shape: f32[1,128], index: 8, kind: input, shape index: {}]   ;;  %s2093_s9 = inlined_call_operand.vmem [shape: f32[256,384], index: 9, kind: output, shape index: {0}]   ;;  %s2094_s10 = inlined_call_operand.vmem [shape: f32[256,128], index: 10, kind: output, shape index: {1}]  }
   0x1 LB: > { %s1271_s14 = sadd.s32 4294967295, %s1655_s13   ;;  %p1275_p0 = scmp.ge.s32.totalorder %s1655_s13, 1  ;;  %s1655_s13 = sphi %s1712_s13, %s21_s13  }
   0x2   : > { %p316_p1 = scmp.lt.s32.totalorder %s1655_s13, 3 }
   0x4   : > { %p317_p2 = pnand %p1275_p0, %p316_p1 }
   0x5   : > { %s1276_s19 = sshll.u32 (!%p317_p2), %s1271_s14, 4 }
   0x6   : > { %320 = sbr.rel (%p317_p2) target bundleno = 870 (0x366), region = 56  ;;  %p361_p3 = scmp.lt.s32.totalorder (!%p317_p2), %s1276_s19, 31 }
   0xb   : > { %v410_v0 = vld [vmem:[%s2085_s1 + $0x78] sm:$0xff]  ;;  %v409_v1 = vld [vmem:[%s2085_s1 + $0x70] sm:$0xff]  ;;  %v408_v2 = vld [vmem:[%s2085_s1 + $0x68] sm:$0xff]  ;;  %s2096_s19 = smov (!%p361_p3, %s1276_s19), 31 }
   0xc   : > { %1416 = vmatprep.subr.mxu0 %v410_v0  ;;  %v407_v3 = vld [vmem:[%s2085_s1 + $0x60] sm:$0xff]  ;;  %s1277_s24 = sshll.u32 %s2096_s19, 3  ;;  %v610_v4 = vld [vmem:[%s2087_s3 + $0x78] sm:$0xff]  ;;  %v609_v6 = vld [vmem:[%s2087_s3 + $0x70] sm:$0xff]  ;;  %s1640_s27 = smul.u32 24, %s2096_s19 }
   0xd   : > { %1417 = vmatpush3.msra.mxu0 %v410_v0  ;;  %v406_v5 = vld [vmem:[%s2085_s1 + $0x58] sm:$0xff]  ;;  %s1746_s11 = scalar_lea.vmem %s2084_s0, %s1277_s24  ;;  %1472 = vmatprep.subr.mxu1 %v610_v4  ;;  %v405_v8 = vld [vmem:[%s2085_s1 + $0x50] sm:$0xff]  ;;  %v608_v9 = vld [vmem:[%s2087_s3 + $0x68] sm:$0xff]  ;;  %s2063_s30 = scalar_lea.vmem %s2094_s10, %s1277_s24 }
   0xe   : > { %1418 = vmatprep.subr.mxu0 %v409_v1  ;;  %v379_v7 = vld [vmem:[%s1746_s11] sm:$0xff]  ;;  %1473 = vmatpush3.msra.mxu1 %v610_v4  ;;  %v404_v10 = vld [vmem:[%s2085_s1 + $0x48] sm:$0xff]  ;;  %v606_v13 = vld [vmem:[%s2087_s3 + $0x58] sm:$0xff]  ;;  %s1890_s14 = scalar_lea.vmem %s2093_s9, %s1640_s27 }
   0xf   : > { %1419 = vmatpush3.msra.mxu0 %v409_v1  ;;  %1448 = vmatprep.mubr.f32.mxu0 %v379_v7  ;;  %v607_v11 = vld [vmem:[%s2087_s3 + $0x60] sm:$0xff]  ;;  %v402_v14 = vld [vmem:[%s2085_s1 + $0x38] sm:$0xff]  ;;  %v605_v15 = vld [vmem:[%s2087_s3 + $0x50] sm:$0xff] }
  0x10   : > { %1420 = vmatprep.subr.mxu0 %v408_v2  ;;  %1474 = vmatprep.subr.mxu1 %v609_v6  ;;  %v403_v12 = vld [vmem:[%s2085_s1 + $0x40] sm:$0xff]  ;;  %v401_v16 = vld [vmem:[%s2085_s1 + $0x30] sm:$0xff]  ;;  %v604_v17 = vld [vmem:[%s2087_s3 + $0x48] sm:$0xff] }
  0x11   : > { %1421 = vmatpush3.msra.mxu0 %v408_v2  ;;  %1475 = vmatpush3.msra.mxu1 %v609_v6  ;;  %v400_v18 = vld [vmem:[%s2085_s1 + $0x28] sm:$0xff]  ;;  %v603_v19 = vld [vmem:[%s2087_s3 + $0x40] sm:$0xff]  ;;  %v602_v21 = vld [vmem:[%s2087_s3 + $0x38] sm:$0xff] }
  0x12   : > { %1422 = vmatprep.subr.mxu0 %v407_v3  ;;  %1476 = vmatprep.subr.mxu1 %v608_v9  ;;  %v399_v20 = vld [vmem:[%s2085_s1 + $0x20] sm:$0xff]  ;;  %v398_v22 = vld [vmem:[%s2085_s1 + $0x18] sm:$0xff]  ;;  %v601_v23 = vld [vmem:[%s2087_s3 + $0x30] sm:$0xff] }
  0x13   : > { %1423 = vmatpush3.msra.mxu0 %v407_v3  ;;  %1477 = vmatpush3.msra.mxu1 %v608_v9  ;;  %v397_v24 = vld [vmem:[%s2085_s1 + $0x10] sm:$0xff]  ;;  %v600_v25 = vld [vmem:[%s2087_s3 + $0x28] sm:$0xff]  ;;  %v599_v27 = vld [vmem:[%s2087_s3 + $0x20] sm:$0xff] }
  0x14   : > { %1424 = vmatprep.subr.mxu0 %v406_v5  ;;  %1478 = vmatprep.subr.mxu1 %v607_v11  ;;  %v396_v26 = vld [vmem:[%s2085_s1 + $0x8] sm:$0xff]  ;;  %v395_v28 = vld [vmem:[%s2085_s1] sm:$0xff]  ;;  %v381_v30 = vld [vmem:[%s1746_s11 + $0x10] sm:$0xff] }
  0x15   : > { %1425 = vmatpush3.msra.mxu0 %v406_v5  ;;  %1479 = vmatpush3.msra.mxu1 %v607_v11  ;;  %v380_v29 = vld [vmem:[%s1746_s11 + $0x8] sm:$0xff]  ;;  %v382_v31 = vld [vmem:[%s1746_s11 + $0x18] sm:$0xff]  ;;  %v383_v32 = vld [vmem:[%s1746_s11 + $0x20] sm:$0xff] }
  0x16   : > { %1426 = vmatprep.subr.mxu0 %v405_v8  ;;  %1480 = vmatprep.subr.mxu1 %v606_v13  ;;  %v384_v33 = vld [vmem:[%s1746_s11 + $0x28] sm:$0xff]  ;;  %v385_v34 = vld [vmem:[%s1746_s11 + $0x30] sm:$0xff]  ;;  %v386_v35 = vld [vmem:[%s1746_s11 + $0x38] sm:$0xff] }
  0x17   : > { %1427 = vmatpush3.msra.mxu0 %v405_v8  ;;  %1481 = vmatpush3.msra.mxu1 %v606_v13  ;;  %v387_v36 = vld [vmem:[%s1746_s11 + $0x40] sm:$0xff]  ;;  %v388_v37 = vld [vmem:[%s1746_s11 + $0x48] sm:$0xff]  ;;  %v389_v38 = vld [vmem:[%s1746_s11 + $0x50] sm:$0xff] }
  0x18   : > { %1428 = vmatprep.subr.mxu0 %v404_v10  ;;  %1482 = vmatprep.subr.mxu1 %v605_v15  ;;  %v390_v39 = vld [vmem:[%s1746_s11 + $0x58] sm:$0xff]  ;;  %v391_v40 = vld [vmem:[%s1746_s11 + $0x60] sm:$0xff]  ;;  %v392_v41 = vld [vmem:[%s1746_s11 + $0x68] sm:$0xff] }
  0x19   : > { %1429 = vmatpush3.msra.mxu0 %v404_v10  ;;  %1483 = vmatpush3.msra.mxu1 %v605_v15  ;;  %v393_v42 = vld [vmem:[%s1746_s11 + $0x70] sm:$0xff]  ;;  %v394_v43 = vld [vmem:[%s1746_s11 + $0x78] sm:$0xff]  ;;  %v596_v46 = vld [vmem:[%s2087_s3 + $0x8] sm:$0xff] }
  0x1a   : > { %1430 = vmatprep.subr.mxu0 %v403_v12  ;;  %1484 = vmatprep.subr.mxu1 %v604_v17  ;;  %v598_v44 = vld [vmem:[%s2087_s3 + $0x18] sm:$0xff]  ;;  %v597_v45 = vld [vmem:[%s2087_s3 + $0x10] sm:$0xff]  ;;  %v595_v47 = vld [vmem:[%s2087_s3] sm:$0xff] }
  0x1b   : > { %1431 = vmatpush3.msra.mxu0 %v403_v12  ;;  %1485 = vmatpush3.msra.mxu1 %v604_v17  ;;  %v810_v48 = vld [vmem:[%s2089_s5 + $0x78] sm:$0xff]  ;;  %v809_v49 = vld [vmem:[%s2089_s5 + $0x70] sm:$0xff]  ;;  %v808_v50 = vld [vmem:[%s2089_s5 + $0x68] sm:$0xff] }
  0x1c   : > { %1432 = vmatprep.subr.mxu0 %v402_v14  ;;  %1486 = vmatprep.subr.mxu1 %v603_v19  ;;  %v807_v51 = vld [vmem:[%s2089_s5 + $0x60] sm:$0xff]  ;;  %v806_v52 = vld [vmem:[%s2089_s5 + $0x58] sm:$0xff]  ;;  %v805_v53 = vld [vmem:[%s2089_s5 + $0x50] sm:$0xff] }
  0x1d   : > { %1433 = vmatpush3.msra.mxu0 %v402_v14  ;;  %1487 = vmatpush3.msra.mxu1 %v603_v19  ;;  %v804_v54 = vld [vmem:[%s2089_s5 + $0x48] sm:$0xff]  ;;  %v803_v55 = vld [vmem:[%s2089_s5 + $0x40] sm:$0xff]  ;;  %v802_v56 = vld [vmem:[%s2089_s5 + $0x38] sm:$0xff] }
  0x1e   : > { %1434 = vmatprep.subr.mxu0 %v401_v16  ;;  %1488 = vmatprep.subr.mxu1 %v602_v21  ;;  %v801_v57 = vld [vmem:[%s2089_s5 + $0x30] sm:$0xff]  ;;  %v800_v58 = vld [vmem:[%s2089_s5 + $0x28] sm:$0xff]  ;;  %v799_v59 = vld [vmem:[%s2089_s5 + $0x20] sm:$0xff] }
  0x1f   : > { %1435 = vmatpush3.msra.mxu0 %v401_v16  ;;  %1489 = vmatpush3.msra.mxu1 %v602_v21  ;;  %v798_v60 = vld [vmem:[%s2089_s5 + $0x18] sm:$0xff]  ;;  %v1885_v61 = vld [vmem:[%s2086_s2] ss:$0 sm:$0xff] }
  0x20   : > { %1436 = vmatprep.subr.mxu0 %v400_v18  ;;  %1490 = vmatprep.subr.mxu1 %v601_v23 }
  0x21   : > { %1437 = vmatpush3.msra.mxu0 %v400_v18  ;;  %1491 = vmatpush3.msra.mxu1 %v601_v23 }
  0x22   : > { %1438 = vmatprep.subr.mxu0 %v399_v20  ;;  %1492 = vmatprep.subr.mxu1 %v600_v25 }
  0x23   : > { %1439 = vmatpush3.msra.mxu0 %v399_v20  ;;  %1493 = vmatpush3.msra.mxu1 %v600_v25 }
  0x24   : > { %1440 = vmatprep.subr.mxu0 %v398_v22  ;;  %1494 = vmatprep.subr.mxu1 %v599_v27 }
  0x25   : > { %1441 = vmatpush3.msra.mxu0 %v398_v22  ;;  %1495 = vmatpush3.msra.mxu1 %v599_v27 }
  0x26   : > { %1442 = vmatprep.subr.mxu0 %v397_v24  ;;  %1496 = vmatprep.subr.mxu1 %v598_v44 }
  0x27   : > { %1443 = vmatpush3.msra.mxu0 %v397_v24  ;;  %1497 = vmatpush3.msra.mxu1 %v598_v44 }
  0x28   : > { %1444 = vmatprep.subr.mxu0 %v396_v26  ;;  %1498 = vmatprep.subr.mxu1 %v597_v45 }
  0x29   : > { %1445 = vmatpush3.msra.mxu0 %v396_v26  ;;  %1499 = vmatpush3.msra.mxu1 %v597_v45 }
  0x2a   : > { %1446 = vmatprep.subr.mxu0 %v395_v28  ;;  %1500 = vmatprep.subr.mxu1 %v596_v46 }
  0x2b   : > { %1447 = vmatpush3.msra.mxu0 %v395_v28  ;;  %1501 = vmatpush3.msra.mxu1 %v596_v46  ;;  %v797_v46 = vld [vmem:[%s2089_s5 + $0x10] sm:$0xff] }
  0x2c   : > { %1449 = vmatmul.mubr.f32.vlgmr.msra.gmra.mxu0 %v380_v29  ;;  %1502 = vmatprep.subr.mxu1 %v595_v47 }
  0x2d   : > { %1451 = vmatprep.mubr.f32.mxu0 %v381_v30  ;;  %1503 = vmatpush3.msra.mxu1 %v595_v47  ;;  %v796_v47 = vld [vmem:[%s2089_s5 + $0x8] sm:$0xff] }
  0x2e   : > { %1528 = vmatprep.subr.mxu0 %v810_v48 }
  0x2f   : > { %1529 = vmatpush3.msra.mxu0 %v810_v48  ;;  %v795_v48 = vld [vmem:[%s2089_s5] sm:$0xff] }
  0x30   : > { %1452 = vmatmul.mubr.f32.gmra.mxu0 %v382_v31  ;;  %1530 = vmatprep.subr.mxu0 %v809_v49 }
  0x31   : > { %1454 = vmatprep.mubr.f32.mxu0 %v383_v32  ;;  %1531 = vmatpush3.msra.mxu0 %v809_v49  ;;  %v1010_v49 = vld [vmem:[%s2091_s7 + $0x78] sm:$0xff] }
  0x32   : > { %1532 = vmatprep.subr.mxu0 %v808_v50  ;;  %1584 = vmatprep.subr.mxu1 %v1010_v49 }
  0x33   : > { %1533 = vmatpush3.msra.mxu0 %v808_v50  ;;  %v1009_v50 = vld [vmem:[%s2091_s7 + $0x70] sm:$0xff] }
  0x34   : > { %1455 = vmatmul.mubr.f32.gmra.mxu0 %v384_v33  ;;  %1534 = vmatprep.subr.mxu0 %v807_v51 }
  0x35   : > { %1457 = vmatprep.mubr.f32.mxu0 %v385_v34  ;;  %1535 = vmatpush3.msra.mxu0 %v807_v51  ;;  %v1008_v51 = vld [vmem:[%s2091_s7 + $0x68] sm:$0xff] }
  0x36   : > { %1536 = vmatprep.subr.mxu0 %v806_v52 }
  0x37   : > { %1537 = vmatpush3.msra.mxu0 %v806_v52  ;;  %v1007_v52 = vld [vmem:[%s2091_s7 + $0x60] sm:$0xff] }
  0x38   : > { %1458 = vmatmul.mubr.f32.gmra.mxu0 %v386_v35  ;;  %1538 = vmatprep.subr.mxu0 %v805_v53 }
  0x39   : > { %1460 = vmatprep.mubr.f32.mxu0 %v387_v36  ;;  %1539 = vmatpush3.msra.mxu0 %v805_v53  ;;  %v1006_v53 = vld [vmem:[%s2091_s7 + $0x58] sm:$0xff] }
  0x3a   : > { %1540 = vmatprep.subr.mxu0 %v804_v54 }
  0x3b   : > { %1541 = vmatpush3.msra.mxu0 %v804_v54  ;;  %v1005_v54 = vld [vmem:[%s2091_s7 + $0x50] sm:$0xff] }
  0x3c   : > { %1461 = vmatmul.mubr.f32.gmra.mxu0 %v388_v37  ;;  %1542 = vmatprep.subr.mxu0 %v803_v55 }
  0x3d   : > { %1463 = vmatprep.mubr.f32.mxu0 %v389_v38  ;;  %1543 = vmatpush3.msra.mxu0 %v803_v55  ;;  %v1004_v55 = vld [vmem:[%s2091_s7 + $0x48] sm:$0xff] }
  0x3e   : > { %1544 = vmatprep.subr.mxu0 %v802_v56 }
  0x3f   : > { %1545 = vmatpush3.msra.mxu0 %v802_v56  ;;  %v1003_v56 = vld [vmem:[%s2091_s7 + $0x40] sm:$0xff] }
  0x40   : > { %1464 = vmatmul.mubr.f32.gmra.mxu0 %v390_v39  ;;  %1546 = vmatprep.subr.mxu0 %v801_v57 }
  0x41   : > { %1466 = vmatprep.mubr.f32.mxu0 %v391_v40  ;;  %1547 = vmatpush3.msra.mxu0 %v801_v57  ;;  %v1002_v57 = vld [vmem:[%s2091_s7 + $0x38] sm:$0xff] }
  0x42   : > { %1548 = vmatprep.subr.mxu0 %v800_v58 }
  0x43   : > { %1549 = vmatpush3.msra.mxu0 %v800_v58  ;;  %v1001_v58 = vld [vmem:[%s2091_s7 + $0x30] sm:$0xff] }
  0x44   : > { %1467 = vmatmul.mubr.f32.gmra.mxu0 %v392_v41  ;;  %1550 = vmatprep.subr.mxu0 %v799_v59 }
  0x45   : > { %1469 = vmatprep.mubr.f32.mxu0 %v393_v42  ;;  %1551 = vmatpush3.msra.mxu0 %v799_v59  ;;  %v1000_v59 = vld [vmem:[%s2091_s7 + $0x28] sm:$0xff] }
  0x46   : > { %1552 = vmatprep.subr.mxu0 %v798_v60 }
  0x47   : > { %1553 = vmatpush3.msra.mxu0 %v798_v60  ;;  %v999_v60 = vld [vmem:[%s2091_s7 + $0x20] sm:$0xff] }
  0x48   : > { %1470 = vmatmul.mubr.f32.gmra.mxu0 %v394_v43  ;;  %1554 = vmatprep.subr.mxu0 %v797_v46 }
  0x49   : > { %1555 = vmatpush3.msra.mxu0 %v797_v46 }
  0x4a   : > { %1556 = vmatprep.subr.mxu0 %v796_v47 }
  0x4b   : > { %1557 = vmatpush3.msra.mxu0 %v796_v47  ;;  %v997_v47 = vld [vmem:[%s2091_s7 + $0x10] sm:$0xff] }
  0x4c   : > { %1558 = vmatprep.subr.mxu0 %v795_v48 }
  0x4d   : > { %1559 = vmatpush3.msra.mxu0 %v795_v48  ;;  %v996_v48 = vld [vmem:[%s2091_s7 + $0x8] sm:$0xff] }
  0xec   : > { %v1450_v62 = vpop.f32.mrf.mxu0 }
  0xed   : > { %v490_v63 = vadd.f32 %v1450_v62, %v1885_v61  ;;  %v1975_v62 = vld [vmem:[%s2088_s4] ss:$0 sm:$0xff] }
  0xee   : > { %v484_v0 = vpop.f32.mrf.mxu0 }
  0xef   : > { %564 = vst [vmem:[%s1890_s14 + $0x18] sm:$0xff] %v490_v63  ;;  %v485_v1 = vadd.f32 %v1885_v61, %v484_v0  ;;  %v580_v5 = vmax.f32 %v490_v63, 0.0 }
  0xf0   : > { %v1453_v2 = vpop.f32.mrf.mxu0 }
  0xf1   : > { %563 = vst [vmem:[%s1890_s14] sm:$0xff] %v485_v1  ;;  %v500_v3 = vadd.f32 %v1453_v2, %v1885_v61  ;;  %v579_v4 = vmax.f32 %v485_v1, 0.0 }
  0xf2   : > { %v494_v6 = vpop.f32.mrf.mxu0 }
  0xf3   : > { %566 = vst [vmem:[%s1890_s14 + $0x48] sm:$0xff] %v500_v3  ;;  %v495_v7 = vadd.f32 %v1885_v61, %v494_v6  ;;  %1504 = vmatprep.mubr.f32.mxu1 %v579_v4  ;;  %v582_v11 = vmax.f32 %v500_v3, 0.0 }
  0xf4   : > { %v1456_v8 = vpop.f32.mrf.mxu0  ;;  %1505 = vmatmul.mubr.f32.vlgmr.msra.gmra.mxu1 %v580_v5 }
  0xf5   : > { %565 = vst [vmem:[%s1890_s14 + $0x30] sm:$0xff] %v495_v7  ;;  %v581_v9 = vmax.f32 %v495_v7, 0.0  ;;  %v510_v10 = vadd.f32 %v1456_v8, %v1885_v61  ;;  %1585 = vmatpush3.msra.mxu1 %v1010_v49  ;;  %v995_v49 = vld [vmem:[%s2091_s7] sm:$0xff] }
  0xf6   : > { %v504_v12 = vpop.f32.mrf.mxu0  ;;  %1586 = vmatprep.subr.mxu1 %v1009_v50 }
  0xf7   : > { %568 = vst [vmem:[%s1890_s14 + $0x78] sm:$0xff] %v510_v10  ;;  %v505_v13 = vadd.f32 %v1885_v61, %v504_v12  ;;  %1507 = vmatprep.mubr.f32.mxu1 %v581_v9  ;;  %v584_v17 = vmax.f32 %v510_v10, 0.0  ;;  %1587 = vmatpush3.msra.mxu1 %v1009_v50  ;;  %v2021_v50 = vld [vmem:[%s2090_s6] ss:$0 sm:$0xff] }
  0xf8   : > { %v1459_v14 = vpop.f32.mrf.mxu0  ;;  %1508 = vmatmul.mubr.f32.gmra.mxu1 %v582_v11  ;;  %1588 = vmatprep.subr.mxu1 %v1008_v51 }
  0xf9   : > { %567 = vst [vmem:[%s1890_s14 + $0x60] sm:$0xff] %v505_v13  ;;  %v583_v15 = vmax.f32 %v505_v13, 0.0  ;;  %v520_v16 = vadd.f32 %v1459_v14, %v1885_v61  ;;  %1589 = vmatpush3.msra.mxu1 %v1008_v51 }
  0xfa   : > { %v514_v18 = vpop.f32.mrf.mxu0  ;;  %1590 = vmatprep.subr.mxu1 %v1007_v52 }
  0xfb   : > { %570 = vst [vmem:[%s1890_s14 + $0xa8] sm:$0xff] %v520_v16  ;;  %v515_v19 = vadd.f32 %v1885_v61, %v514_v18  ;;  %1510 = vmatprep.mubr.f32.mxu1 %v583_v15  ;;  %v586_v23 = vmax.f32 %v520_v16, 0.0  ;;  %1591 = vmatpush3.msra.mxu1 %v1007_v52 }
  0xfc   : > { %v1462_v20 = vpop.f32.mrf.mxu0  ;;  %1511 = vmatmul.mubr.f32.gmra.mxu1 %v584_v17  ;;  %1592 = vmatprep.subr.mxu1 %v1006_v53 }
  0xfd   : > { %569 = vst [vmem:[%s1890_s14 + $0x90] sm:$0xff] %v515_v19  ;;  %v585_v21 = vmax.f32 %v515_v19, 0.0  ;;  %v530_v22 = vadd.f32 %v1462_v20, %v1885_v61  ;;  %1593 = vmatpush3.msra.mxu1 %v1006_v53 }
  0xfe   : > { %v524_v24 = vpop.f32.mrf.mxu0  ;;  %1594 = vmatprep.subr.mxu1 %v1005_v54 }
  0xff   : > { %572 = vst [vmem:[%s1890_s14 + $0xd8] sm:$0xff] %v530_v22  ;;  %v525_v25 = vadd.f32 %v1885_v61, %v524_v24  ;;  %1513 = vmatprep.mubr.f32.mxu1 %v585_v21  ;;  %v588_v29 = vmax.f32 %v530_v22, 0.0  ;;  %1595 = vmatpush3.msra.mxu1 %v1005_v54 }
 0x100   : > { %v1465_v26 = vpop.f32.mrf.mxu0  ;;  %1514 = vmatmul.mubr.f32.gmra.mxu1 %v586_v23  ;;  %1596 = vmatprep.subr.mxu1 %v1004_v55 }
 0x101   : > { %571 = vst [vmem:[%s1890_s14 + $0xc0] sm:$0xff] %v525_v25  ;;  %v587_v27 = vmax.f32 %v525_v25, 0.0  ;;  %v540_v28 = vadd.f32 %v1465_v26, %v1885_v61  ;;  %1597 = vmatpush3.msra.mxu1 %v1004_v55 }
 0x102   : > { %v534_v30 = vpop.f32.mrf.mxu0  ;;  %1598 = vmatprep.subr.mxu1 %v1003_v56 }
 0x103   : > { %574 = vst [vmem:[%s1890_s14 + $0x108] sm:$0xff] %v540_v28  ;;  %v535_v31 = vadd.f32 %v1885_v61, %v534_v30  ;;  %1516 = vmatprep.mubr.f32.mxu1 %v587_v27  ;;  %v590_v35 = vmax.f32 %v540_v28, 0.0  ;;  %1599 = vmatpush3.msra.mxu1 %v1003_v56 }
 0x104   : > { %v1468_v32 = vpop.f32.mrf.mxu0  ;;  %1517 = vmatmul.mubr.f32.gmra.mxu1 %v588_v29  ;;  %1600 = vmatprep.subr.mxu1 %v1002_v57 }
 0x105   : > { %573 = vst [vmem:[%s1890_s14 + $0xf0] sm:$0xff] %v535_v31  ;;  %v589_v33 = vmax.f32 %v535_v31, 0.0  ;;  %v550_v34 = vadd.f32 %v1468_v32, %v1885_v61  ;;  %1601 = vmatpush3.msra.mxu1 %v1002_v57 }
 0x106   : > { %v544_v36 = vpop.f32.mrf.mxu0  ;;  %1602 = vmatprep.subr.mxu1 %v1001_v58 }
 0x107   : > { %576 = vst [vmem:[%s1890_s14 + $0x138] sm:$0xff] %v550_v34  ;;  %v545_v37 = vadd.f32 %v1885_v61, %v544_v36  ;;  %1519 = vmatprep.mubr.f32.mxu1 %v589_v33  ;;  %v592_v41 = vmax.f32 %v550_v34, 0.0  ;;  %1603 = vmatpush3.msra.mxu1 %v1001_v58 }
 0x108   : > { %v1471_v38 = vpop.f32.mrf.mxu0  ;;  %1520 = vmatmul.mubr.f32.gmra.mxu1 %v590_v35  ;;  %1604 = vmatprep.subr.mxu1 %v1000_v59 }
 0x109   : > { %575 = vst [vmem:[%s1890_s14 + $0x120] sm:$0xff] %v545_v37  ;;  %v591_v39 = vmax.f32 %v545_v37, 0.0  ;;  %v560_v40 = vadd.f32 %v1471_v38, %v1885_v61  ;;  %1605 = vmatpush3.msra.mxu1 %v1000_v59 }
 0x10a   : > { %v554_v42 = vpop.f32.mrf.mxu0  ;;  %1606 = vmatprep.subr.mxu1 %v999_v60 }
 0x10b   : > { %578 = vst [vmem:[%s1890_s14 + $0x168] sm:$0xff] %v560_v40  ;;  %v555_v43 = vadd.f32 %v1885_v61, %v554_v42  ;;  %1522 = vmatprep.mubr.f32.mxu1 %v591_v39  ;;  %v594_v45 = vmax.f32 %v560_v40, 0.0  ;;  %v998_v61 = vld [vmem:[%s2091_s7 + $0x18] sm:$0xff]  ;;  %1607 = vmatpush3.msra.mxu1 %v999_v60 }
 0x10c   : > { %1523 = vmatmul.mubr.f32.gmra.mxu1 %v592_v41  ;;  %1608 = vmatprep.subr.mxu1 %v998_v61 }
 0x10d   : > { %577 = vst [vmem:[%s1890_s14 + $0x150] sm:$0xff] %v555_v43  ;;  %v593_v44 = vmax.f32 %v555_v43, 0.0  ;;  %1609 = vmatpush3.msra.mxu1 %v998_v61 }
 0x10e   : > { %1610 = vmatprep.subr.mxu1 %v997_v47 }
 0x10f   : > { %1525 = vmatprep.mubr.f32.mxu1 %v593_v44  ;;  %1611 = vmatpush3.msra.mxu1 %v997_v47 }
 0x110   : > { %1526 = vmatmul.mubr.f32.gmra.mxu1 %v594_v45  ;;  %1612 = vmatprep.subr.mxu1 %v996_v48 }
 0x111   : > { %1613 = vmatpush3.msra.mxu1 %v996_v48 }
 0x112   : > { %1614 = vmatprep.subr.mxu1 %v995_v49 }
 0x113   : > { %1615 = vmatpush3.msra.mxu1 %v995_v49 }
 0x1b4   : > { %v1506_v63 = vpop.f32.mrf.mxu1 }
 0x1b5   : > { %v690_v0 = vadd.f32 %v1506_v63, %v1975_v62 }
 0x1b6   : > { %v684_v1 = vpop.f32.mrf.mxu1 }
 0x1b7   : > { %764 = vst [vmem:[%s1890_s14 + $0x20] sm:$0xff] %v690_v0  ;;  %v685_v2 = vadd.f32 %v1975_v62, %v684_v1  ;;  %v780_v6 = vmax.f32 %v690_v0, 0.0 }
 0x1b8   : > { %v1509_v3 = vpop.f32.mrf.mxu1 }
 0x1b9   : > { %763 = vst [vmem:[%s1890_s14 + $0x8] sm:$0xff] %v685_v2  ;;  %v779_v4 = vmax.f32 %v685_v2, 0.0  ;;  %v700_v5 = vadd.f32 %v1509_v3, %v1975_v62 }
 0x1ba   : > { %v694_v7 = vpop.f32.mrf.mxu1 }
 0x1bb   : > { %766 = vst [vmem:[%s1890_s14 + $0x50] sm:$0xff] %v700_v5  ;;  %v695_v8 = vadd.f32 %v1975_v62, %v694_v7  ;;  %1560 = vmatprep.mubr.f32.mxu0 %v779_v4  ;;  %v782_v12 = vmax.f32 %v700_v5, 0.0 }
 0x1bc   : > { %v1512_v9 = vpop.f32.mrf.mxu1  ;;  %1561 = vmatmul.mubr.f32.vlgmr.msra.gmra.mxu0 %v780_v6 }
 0x1bd   : > { %765 = vst [vmem:[%s1890_s14 + $0x38] sm:$0xff] %v695_v8  ;;  %v781_v10 = vmax.f32 %v695_v8, 0.0  ;;  %v710_v11 = vadd.f32 %v1512_v9, %v1975_v62 }
 0x1be   : > { %v704_v13 = vpop.f32.mrf.mxu1 }
 0x1bf   : > { %768 = vst [vmem:[%s1890_s14 + $0x80] sm:$0xff] %v710_v11  ;;  %v705_v14 = vadd.f32 %v1975_v62, %v704_v13  ;;  %1563 = vmatprep.mubr.f32.mxu0 %v781_v10  ;;  %v784_v18 = vmax.f32 %v710_v11, 0.0 }
 0x1c0   : > { %v1515_v15 = vpop.f32.mrf.mxu1  ;;  %1564 = vmatmul.mubr.f32.gmra.mxu0 %v782_v12 }
 0x1c1   : > { %767 = vst [vmem:[%s1890_s14 + $0x68] sm:$0xff] %v705_v14  ;;  %v783_v16 = vmax.f32 %v705_v14, 0.0  ;;  %v720_v17 = vadd.f32 %v1515_v15, %v1975_v62 }
 0x1c2   : > { %v714_v19 = vpop.f32.mrf.mxu1 }
 0x1c3   : > { %770 = vst [vmem:[%s1890_s14 + $0xb0] sm:$0xff] %v720_v17  ;;  %v715_v20 = vadd.f32 %v1975_v62, %v714_v19  ;;  %1566 = vmatprep.mubr.f32.mxu0 %v783_v16  ;;  %v786_v24 = vmax.f32 %v720_v17, 0.0 }
 0x1c4   : > { %v1518_v21 = vpop.f32.mrf.mxu1  ;;  %1567 = vmatmul.mubr.f32.gmra.mxu0 %v784_v18 }
 0x1c5   : > { %769 = vst [vmem:[%s1890_s14 + $0x98] sm:$0xff] %v715_v20  ;;  %v785_v22 = vmax.f32 %v715_v20, 0.0  ;;  %v730_v23 = vadd.f32 %v1518_v21, %v1975_v62 }
 0x1c6   : > { %v724_v25 = vpop.f32.mrf.mxu1 }
 0x1c7   : > { %772 = vst [vmem:[%s1890_s14 + $0xe0] sm:$0xff] %v730_v23  ;;  %v725_v26 = vadd.f32 %v1975_v62, %v724_v25  ;;  %1569 = vmatprep.mubr.f32.mxu0 %v785_v22  ;;  %v788_v30 = vmax.f32 %v730_v23, 0.0 }
 0x1c8   : > { %v1521_v27 = vpop.f32.mrf.mxu1  ;;  %1570 = vmatmul.mubr.f32.gmra.mxu0 %v786_v24 }
 0x1c9   : > { %771 = vst [vmem:[%s1890_s14 + $0xc8] sm:$0xff] %v725_v26  ;;  %v787_v28 = vmax.f32 %v725_v26, 0.0  ;;  %v740_v29 = vadd.f32 %v1521_v27, %v1975_v62 }
 0x1ca   : > { %v734_v31 = vpop.f32.mrf.mxu1 }
 0x1cb   : > { %774 = vst [vmem:[%s1890_s14 + $0x110] sm:$0xff] %v740_v29  ;;  %v735_v32 = vadd.f32 %v1975_v62, %v734_v31  ;;  %1572 = vmatprep.mubr.f32.mxu0 %v787_v28  ;;  %v790_v36 = vmax.f32 %v740_v29, 0.0 }
 0x1cc   : > { %v1524_v33 = vpop.f32.mrf.mxu1  ;;  %1573 = vmatmul.mubr.f32.gmra.mxu0 %v788_v30 }
 0x1cd   : > { %773 = vst [vmem:[%s1890_s14 + $0xf8] sm:$0xff] %v735_v32  ;;  %v789_v34 = vmax.f32 %v735_v32, 0.0  ;;  %v750_v35 = vadd.f32 %v1524_v33, %v1975_v62 }
 0x1ce   : > { %v744_v37 = vpop.f32.mrf.mxu1 }
 0x1cf   : > { %776 = vst [vmem:[%s1890_s14 + $0x140] sm:$0xff] %v750_v35  ;;  %v745_v38 = vadd.f32 %v1975_v62, %v744_v37  ;;  %1575 = vmatprep.mubr.f32.mxu0 %v789_v34  ;;  %v792_v42 = vmax.f32 %v750_v35, 0.0  ;;  %v1285_v35 = vld [vmem:[%s2092_s8] ss:$0 sm:$0xff] }
 0x1d0   : > { %v1527_v39 = vpop.f32.mrf.mxu1  ;;  %1576 = vmatmul.mubr.f32.gmra.mxu0 %v790_v36 }
 0x1d1   : > { %775 = vst [vmem:[%s1890_s14 + $0x128] sm:$0xff] %v745_v38  ;;  %v791_v40 = vmax.f32 %v745_v38, 0.0  ;;  %v760_v41 = vadd.f32 %v1527_v39, %v1975_v62 }
 0x1d2   : > { %v754_v43 = vpop.f32.mrf.mxu1 }
 0x1d3   : > { %778 = vst [vmem:[%s1890_s14 + $0x170] sm:$0xff] %v760_v41  ;;  %v755_v44 = vadd.f32 %v1975_v62, %v754_v43  ;;  %1578 = vmatprep.mubr.f32.mxu0 %v791_v40  ;;  %v794_v46 = vmax.f32 %v760_v41, 0.0 }
 0x1d4   : > { %1579 = vmatmul.mubr.f32.gmra.mxu0 %v792_v42 }
 0x1d5   : > { %777 = vst [vmem:[%s1890_s14 + $0x158] sm:$0xff] %v755_v44  ;;  %v793_v45 = vmax.f32 %v755_v44, 0.0 }
 0x1d7   : > { %1581 = vmatprep.mubr.f32.mxu0 %v793_v45 }
 0x1d8   : > { %1582 = vmatmul.mubr.f32.gmra.mxu0 %v794_v46 }
 0x27c   : > { %v1562_v51 = vpop.f32.mrf.mxu0 }
 0x27d   : > { %v890_v52 = vadd.f32 %v1562_v51, %v2021_v50 }
 0x27e   : > { %v884_v53 = vpop.f32.mrf.mxu0 }
 0x27f   : > { %964 = vst [vmem:[%s1890_s14 + $0x28] sm:$0xff] %v890_v52  ;;  %v885_v54 = vadd.f32 %v2021_v50, %v884_v53  ;;  %v980_v58 = vmax.f32 %v890_v52, 0.0 }
 0x280   : > { %v1565_v55 = vpop.f32.mrf.mxu0 }
 0x281   : > { %963 = vst [vmem:[%s1890_s14 + $0x10] sm:$0xff] %v885_v54  ;;  %v979_v56 = vmax.f32 %v885_v54, 0.0  ;;  %v900_v57 = vadd.f32 %v1565_v55, %v2021_v50 }
 0x282   : > { %v894_v59 = vpop.f32.mrf.mxu0 }
 0x283   : > { %966 = vst [vmem:[%s1890_s14 + $0x58] sm:$0xff] %v900_v57  ;;  %v895_v60 = vadd.f32 %v2021_v50, %v894_v59  ;;  %1616 = vmatprep.mubr.f32.mxu1 %v979_v56  ;;  %v982_v0 = vmax.f32 %v900_v57, 0.0 }
 0x284   : > { %v1568_v61 = vpop.f32.mrf.mxu0  ;;  %1617 = vmatmul.mubr.f32.vlgmr.msra.gmra.mxu1 %v980_v58 }
 0x285   : > { %965 = vst [vmem:[%s1890_s14 + $0x40] sm:$0xff] %v895_v60  ;;  %v981_v62 = vmax.f32 %v895_v60, 0.0  ;;  %v910_v63 = vadd.f32 %v1568_v61, %v2021_v50 }
 0x286   : > { %v904_v1 = vpop.f32.mrf.mxu0 }
 0x287   : > { %968 = vst [vmem:[%s1890_s14 + $0x88] sm:$0xff] %v910_v63  ;;  %v905_v2 = vadd.f32 %v2021_v50, %v904_v1  ;;  %1619 = vmatprep.mubr.f32.mxu1 %v981_v62  ;;  %v984_v6 = vmax.f32 %v910_v63, 0.0 }
 0x288   : > { %v1571_v3 = vpop.f32.mrf.mxu0  ;;  %1620 = vmatmul.mubr.f32.gmra.mxu1 %v982_v0 }
 0x289   : > { %967 = vst [vmem:[%s1890_s14 + $0x70] sm:$0xff] %v905_v2  ;;  %v983_v4 = vmax.f32 %v905_v2, 0.0  ;;  %v920_v5 = vadd.f32 %v1571_v3, %v2021_v50 }
 0x28a   : > { %v914_v7 = vpop.f32.mrf.mxu0 }
 0x28b   : > { %970 = vst [vmem:[%s1890_s14 + $0xb8] sm:$0xff] %v920_v5  ;;  %v915_v8 = vadd.f32 %v2021_v50, %v914_v7  ;;  %1622 = vmatprep.mubr.f32.mxu1 %v983_v4  ;;  %v986_v12 = vmax.f32 %v920_v5, 0.0 }
 0x28c   : > { %v1574_v9 = vpop.f32.mrf.mxu0  ;;  %1623 = vmatmul.mubr.f32.gmra.mxu1 %v984_v6 }
 0x28d   : > { %969 = vst [vmem:[%s1890_s14 + $0xa0] sm:$0xff] %v915_v8  ;;  %v985_v10 = vmax.f32 %v915_v8, 0.0  ;;  %v930_v11 = vadd.f32 %v1574_v9, %v2021_v50 }
 0x28e   : > { %v924_v13 = vpop.f32.mrf.mxu0 }
 0x28f   : > { %972 = vst [vmem:[%s1890_s14 + $0xe8] sm:$0xff] %v930_v11  ;;  %v925_v14 = vadd.f32 %v2021_v50, %v924_v13  ;;  %1625 = vmatprep.mubr.f32.mxu1 %v985_v10  ;;  %v988_v18 = vmax.f32 %v930_v11, 0.0 }
 0x290   : > { %v1577_v15 = vpop.f32.mrf.mxu0  ;;  %1626 = vmatmul.mubr.f32.gmra.mxu1 %v986_v12 }
 0x291   : > { %971 = vst [vmem:[%s1890_s14 + $0xd0] sm:$0xff] %v925_v14  ;;  %v987_v16 = vmax.f32 %v925_v14, 0.0  ;;  %v940_v17 = vadd.f32 %v1577_v15, %v2021_v50 }
 0x292   : > { %v934_v19 = vpop.f32.mrf.mxu0 }
 0x293   : > { %974 = vst [vmem:[%s1890_s14 + $0x118] sm:$0xff] %v940_v17  ;;  %v935_v20 = vadd.f32 %v2021_v50, %v934_v19  ;;  %1628 = vmatprep.mubr.f32.mxu1 %v987_v16  ;;  %v990_v24 = vmax.f32 %v940_v17, 0.0 }
 0x294   : > { %v1580_v21 = vpop.f32.mrf.mxu0  ;;  %1629 = vmatmul.mubr.f32.gmra.mxu1 %v988_v18 }
 0x295   : > { %973 = vst [vmem:[%s1890_s14 + $0x100] sm:$0xff] %v935_v20  ;;  %v989_v22 = vmax.f32 %v935_v20, 0.0  ;;  %v950_v23 = vadd.f32 %v1580_v21, %v2021_v50 }
 0x296   : > { %v944_v25 = vpop.f32.mrf.mxu0 }
 0x297   : > { %976 = vst [vmem:[%s1890_s14 + $0x148] sm:$0xff] %v950_v23  ;;  %v945_v26 = vadd.f32 %v2021_v50, %v944_v25  ;;  %1631 = vmatprep.mubr.f32.mxu1 %v989_v22  ;;  %v992_v30 = vmax.f32 %v950_v23, 0.0 }
 0x298   : > { %v1583_v27 = vpop.f32.mrf.mxu0  ;;  %1632 = vmatmul.mubr.f32.gmra.mxu1 %v990_v24 }
 0x299   : > { %975 = vst [vmem:[%s1890_s14 + $0x130] sm:$0xff] %v945_v26  ;;  %v991_v28 = vmax.f32 %v945_v26, 0.0  ;;  %v960_v29 = vadd.f32 %v1583_v27, %v2021_v50 }
 0x29a   : > { %v954_v31 = vpop.f32.mrf.mxu0 }
 0x29b   : > { %978 = vst [vmem:[%s1890_s14 + $0x178] sm:$0xff] %v960_v29  ;;  %v955_v32 = vadd.f32 %v2021_v50, %v954_v31  ;;  %1634 = vmatprep.mubr.f32.mxu1 %v991_v28  ;;  %v994_v34 = vmax.f32 %v960_v29, 0.0 }
 0x29c   : > { %1635 = vmatmul.mubr.f32.gmra.mxu1 %v992_v30 }
 0x29d   : > { %977 = vst [vmem:[%s1890_s14 + $0x160] sm:$0xff] %v955_v32  ;;  %v993_v33 = vmax.f32 %v955_v32, 0.0 }
 0x29f   : > { %1637 = vmatprep.mubr.f32.mxu1 %v993_v33 }
 0x2a0   : > { %1638 = vmatmul.mubr.f32.gmra.mxu1 %v994_v34 }
 0x344   : > { %v1618_v36 = vpop.f32.mrf.mxu1 }
 0x345   : > { %v1090_v37 = vadd.f32 %v1618_v36, %v1285_v35 }
 0x346   : > { %v1084_v38 = vpop.f32.mrf.mxu1 }
 0x347   : > { %1164 = vst [vmem:[%s2063_s30 + $0x8] sm:$0xff] %v1090_v37  ;;  %v1085_v39 = vadd.f32 %v1285_v35, %v1084_v38 }
 0x348   : > { %v1621_v40 = vpop.f32.mrf.mxu1 }
 0x349   : > { %1163 = vst [vmem:[%s2063_s30] sm:$0xff] %v1085_v39  ;;  %v1100_v41 = vadd.f32 %v1621_v40, %v1285_v35 }
 0x34a   : > { %v1094_v42 = vpop.f32.mrf.mxu1 }
 0x34b   : > { %1166 = vst [vmem:[%s2063_s30 + $0x18] sm:$0xff] %v1100_v41  ;;  %v1095_v43 = vadd.f32 %v1285_v35, %v1094_v42 }
 0x34c   : > { %v1624_v44 = vpop.f32.mrf.mxu1 }
 0x34d   : > { %1165 = vst [vmem:[%s2063_s30 + $0x10] sm:$0xff] %v1095_v43  ;;  %v1110_v45 = vadd.f32 %v1624_v44, %v1285_v35 }
 0x34e   : > { %v1104_v46 = vpop.f32.mrf.mxu1 }
 0x34f   : > { %1168 = vst [vmem:[%s2063_s30 + $0x28] sm:$0xff] %v1110_v45  ;;  %v1105_v47 = vadd.f32 %v1285_v35, %v1104_v46 }
 0x350   : > { %v1627_v48 = vpop.f32.mrf.mxu1 }
 0x351   : > { %1167 = vst [vmem:[%s2063_s30 + $0x20] sm:$0xff] %v1105_v47  ;;  %v1120_v49 = vadd.f32 %v1627_v48, %v1285_v35 }
 0x352   : > { %v1114_v50 = vpop.f32.mrf.mxu1 }
 0x353   : > { %1170 = vst [vmem:[%s2063_s30 + $0x38] sm:$0xff] %v1120_v49  ;;  %v1115_v51 = vadd.f32 %v1285_v35, %v1114_v50 }
 0x354   : > { %v1630_v52 = vpop.f32.mrf.mxu1 }
 0x355   : > { %1169 = vst [vmem:[%s2063_s30 + $0x30] sm:$0xff] %v1115_v51  ;;  %v1130_v53 = vadd.f32 %v1630_v52, %v1285_v35 }
 0x356   : > { %v1124_v54 = vpop.f32.mrf.mxu1 }
 0x357   : > { %1172 = vst [vmem:[%s2063_s30 + $0x48] sm:$0xff] %v1130_v53  ;;  %v1125_v55 = vadd.f32 %v1285_v35, %v1124_v54 }
 0x358   : > { %v1633_v56 = vpop.f32.mrf.mxu1 }
 0x359   : > { %1171 = vst [vmem:[%s2063_s30 + $0x40] sm:$0xff] %v1125_v55  ;;  %v1140_v57 = vadd.f32 %v1633_v56, %v1285_v35 }
 0x35a   : > { %v1134_v58 = vpop.f32.mrf.mxu1 }
 0x35b   : > { %1174 = vst [vmem:[%s2063_s30 + $0x58] sm:$0xff] %v1140_v57  ;;  %v1135_v59 = vadd.f32 %v1285_v35, %v1134_v58 }
 0x35c   : > { %v1636_v60 = vpop.f32.mrf.mxu1 }
 0x35d   : > { %1173 = vst [vmem:[%s2063_s30 + $0x50] sm:$0xff] %v1135_v59  ;;  %v1150_v61 = vadd.f32 %v1636_v60, %v1285_v35 }
 0x35e   : > { %v1144_v62 = vpop.f32.mrf.mxu1 }
 0x35f   : > { %1176 = vst [vmem:[%s2063_s30 + $0x68] sm:$0xff] %v1150_v61  ;;  %v1145_v63 = vadd.f32 %v1285_v35, %v1144_v62 }
 0x360   : > { %v1639_v0 = vpop.f32.mrf.mxu1 }
 0x361   : > { %1175 = vst [vmem:[%s2063_s30 + $0x60] sm:$0xff] %v1145_v63  ;;  %v1160_v1 = vadd.f32 %v1639_v0, %v1285_v35 }
 0x362   : > { %v1154_v2 = vpop.f32.mrf.mxu1 }
 0x363   : > { %1178 = vst [vmem:[%s2063_s30 + $0x78] sm:$0xff] %v1160_v1  ;;  %v1155_v3 = vadd.f32 %v1285_v35, %v1154_v2 }
 0x365   : > { %1177 = vst [vmem:[%s2063_s30 + $0x70] sm:$0xff] %v1155_v3 }
 0x366 PF: > { %s21_s13 = sadd.s32 1, %s1655_s13  }
 0x367   : > { %p18_p4 = scmp.ge.s32.totalorder %s21_s13, 4  }
 0x369   :  { %20 = sbr.rel (!%p18_p4) target bundleno = 1 (0x1), region = 98 }

</bundles_post_ra>
